<compile_context>
chip_gen: v7x
topology: tpu7x:2x2x1
jax: 0.10.0
libtpu: 0.0.40
codegen_flags: <defaults>
</compile_context>

<pallas_src>
import jax
import jax.numpy as jnp
from jax.experimental import pallas as pl
from jax.experimental.pallas import tpu as pltpu

HIDDEN = 200          # logical hidden width (PyTorch fc1 out_features)
H_PAD = 256           # hidden width padded to a lane multiple
NEG_SLOPE = 0.01      # PyTorch F.leaky_relu default


def _round_up(n, m):
    return ((n + m - 1) // m) * m


def _cdiv(a, b):
    return (a + b - 1) // b


def _vmem_budget_and_limit():
    """Generation-aware VMEM planning budget and vmem_limit cap (bytes)."""
    cap = None
    try:
        cap = getattr(pltpu.get_tpu_info(), "vmem_capacity_bytes", None)
    except Exception:
        cap = None
    if cap is None:
        cap = 64 * 1024 * 1024                       # conservative default (v7x-like)
    if cap >= 100 * 1024 * 1024:                     # v5e / v6e: 128 MiB physical
        return 100 * 1024 * 1024, 120 * 1024 * 1024
    return 44 * 1024 * 1024, 56 * 1024 * 1024        # v7x: 64 MiB per TensorCore


# ----------------------------------------------------------------------------
# Kernels
# ----------------------------------------------------------------------------
def _disnet_kernel(x_ref, w1_ref, b1_ref, w2_ref, b2_ref, o_ref):
    # fc1 on the MXU: cast x to bf16 in-kernel (no wrapper materialization),
    # bf16 x bf16 -> f32 accumulate.
    xb = x_ref[...].astype(jnp.bfloat16)
    h = jnp.dot(xb, w1_ref[...], preferred_element_type=jnp.float32)
    h = h + b1_ref[...]                                   # (1, 256) broadcast, f32
    h = jnp.maximum(h, NEG_SLOPE * h)                     # leaky_relu, single max
    # fc3: N=1 matmul as VPU multiply + lane reduction (keeps MXU on fc1).
    y = jnp.sum(h * w2_ref[...], axis=-1, keepdims=True)  # (TB, 1) f32
    o_ref[...] = (y + b2_ref[0, 0]).astype(o_ref.dtype)


def _disnet_kernel_ktiled(x_ref, w1_ref, b1_ref, w2_ref, b2_ref, o_ref, acc_ref):
    # Large dim_in path: stream w1 in (tk, 256) chunks along the second grid
    # axis ("arbitrary"), accumulate fc1 in an f32 VMEM scratch.
    k = pl.program_id(1)

    @pl.when(k == 0)
    def _():
        acc_ref[...] = jnp.zeros_like(acc_ref)

    xb = x_ref[...].astype(jnp.bfloat16)
    acc_ref[...] += jnp.dot(xb, w1_ref[...], preferred_element_type=jnp.float32)

    @pl.when(k == pl.num_programs(1) - 1)
    def _():
        h = acc_ref[...] + b1_ref[...]
        h = jnp.maximum(h, NEG_SLOPE * h)
        y = jnp.sum(h * w2_ref[...], axis=-1, keepdims=True)
        o_ref[...] = (y + b2_ref[0, 0]).astype(o_ref.dtype)


# ----------------------------------------------------------------------------
# VMEM usage estimates (bytes)
# ----------------------------------------------------------------------------
def _vmem_bytes_flat(tb, d, x_itemsize, w1_buffers):
    return (2 * tb * d * x_itemsize        # x tiles, double-buffered
            + tb * d * 2                   # in-kernel bf16 cast intermediate
            + w1_buffers * d * H_PAD * 2   # resident w1, bf16
            + 4 * H_PAD * 4                # b1 + w2 row
            + 2 * tb * 4                   # output tiles
            + 2 * tb * H_PAD * 4)          # f32 intermediates / headroom


def _vmem_bytes_ktiled(tb, tk, x_itemsize):
    return (2 * tb * tk * x_itemsize       # x tiles
            + tb * tk * 2                  # in-kernel bf16 cast intermediate
            + 2 * tk * H_PAD * 2           # w1 chunks, double-buffered bf16
            + 4 * H_PAD * 4                # b1 + w2 row
            + 2 * tb * 4                   # output tiles
            + 2 * tb * H_PAD * 4)          # f32 accumulator scratch + headroom


# ----------------------------------------------------------------------------
# Wrapper
# ----------------------------------------------------------------------------
def disnet_forward(x, w1, b1, w2, b2, *, block_b=512, k_block=None):
    """DisNet forward: leaky_relu(x @ w1 + b1) @ w2 + b2.

    x : (B, D) f32 or bf16 (pass bf16 from the producer for minimum HBM traffic)
    w1: (D, 200)   b1: (1, 200)   w2: (200, 1)   b2: (1, 1)
    """
    B, D = x.shape
    x_item = jnp.dtype(x.dtype).itemsize
    budget, limit_cap = _vmem_budget_and_limit()

    # --- weights: pad hidden 200 -> 256 (padded lanes contribute exactly zero).
    w1p = jnp.pad(w1, ((0, 0), (0, H_PAD - HIDDEN))).astype(jnp.bfloat16)
    b1p = jnp.pad(b1.reshape(1, HIDDEN),
                  ((0, 0), (0, H_PAD - HIDDEN))).astype(jnp.float32)
    w2row = jnp.pad(w2.reshape(1, HIDDEN),
                    ((0, 0), (0, H_PAD - HIDDEN))).astype(jnp.float32)
    b2s = jnp.asarray(b2, jnp.float32).reshape(1, 1)

    # --- K (dim_in) tiling when resident w1 would eat > ~1/3 of the budget.
    w1_resident_bytes = D * H_PAD * 2
    use_k = (k_block is not None) or (w1_resident_bytes > budget // 3)

    def pick_tb(fits):
        tb = _round_up(min(block_b, _round_up(B, 16)), 16)
        while tb > 16 and not fits(tb):
            tb = max(16, _round_up(tb // 2, 16))
        # Megacore (v7x has 2 TCs): guarantee >= 2 grid steps along batch.
        # Negligible cost on single-core v5e/v6e.
        if _cdiv(B, tb) < 2 and B > 16:
            tb = max(16, _round_up(_cdiv(B, 2), 16))
        return tb

    def maybe_pad_batch(arr, tb):
        # No full-batch copy: Pallas handles ragged boundary blocks.  Only pad
        # when B is smaller than a single tile.
        if B < tb:
            return jnp.pad(arr, ((0, tb - B), (0, 0))), tb
        return arr, B

    if not use_k:
        # ------------------------------ flat path (whole dim_in per step) ----
        tb = pick_tb(lambda t: _vmem_bytes_flat(t, D, x_item, 1) <= budget)
        xp, B_eff = maybe_pad_batch(x, tb)
        grid = (_cdiv(B_eff, tb),)

        vmem_limit = int(min(limit_cap,
                             max(32 * 1024 * 1024,
                                 _vmem_bytes_flat(tb, D, x_item, 2)
                                 + 8 * 1024 * 1024)))
        cost = pl.CostEstimate(
            flops=int(2 * B_eff * D * H_PAD + 4 * B_eff * H_PAD),
            transcendentals=0,
            bytes_accessed=int(xp.size * x_item + w1p.size * 2
                               + (b1p.size + w2row.size + b2s.size) * 4
                               + B_eff * 4),
        )

        def call(single_buffer):
            def rspec(shape, imap):
                if single_buffer:
                    return pl.BlockSpec(shape, imap, pipeline_mode=pl.Buffered(1))
                return pl.BlockSpec(shape, imap)

            in_specs = [
                pl.BlockSpec((tb, D), lambda i: (i, 0)),            # x: batch-tiled
                rspec((D, H_PAD), lambda i: (0, 0)),                # w1: resident
                rspec((1, H_PAD), lambda i: (0, 0)),                # b1: resident
                rspec((1, H_PAD), lambda i: (0, 0)),                # w2 row: resident
                pl.BlockSpec(memory_space=pltpu.MemorySpace.SMEM),  # b2: scalar
            ]
            return pl.pallas_call(
                _disnet_kernel,
                out_shape=jax.ShapeDtypeStruct((B_eff, 1), jnp.float32),
                grid=grid,
                in_specs=in_specs,
                out_specs=pl.BlockSpec((tb, 1), lambda i: (i, 0)),
                compiler_params=pltpu.CompilerParams(
                    dimension_semantics=("parallel",),
                    vmem_limit_bytes=vmem_limit,
                ),
                cost_estimate=cost,
            )(xp, w1p, b1p, w2row, b2s)

        try:
            out = call(True)   # single-buffered resident weights (saves VMEM)
        except Exception:
            out = call(False)  # fall back to default double-buffering
        return out[:B] if B_eff != B else out

    # ---------------------------------- K-tiled path (large dim_in) ----------
    tk = k_block if k_block is not None else 2048
    tk = _round_up(min(tk, _round_up(D, 128)), 128)
    D_pad = _round_up(D, tk)

    tb = pick_tb(lambda t: _vmem_bytes_ktiled(t, tk, x_item) <= budget)

    # Zero-pad the contraction dim only (padded columns/rows contribute zero).
    xp = x if D_pad == D else jnp.pad(x, ((0, 0), (0, D_pad - D)))
    w1k = w1p if D_pad == D else jnp.pad(w1p, ((0, D_pad - D), (0, 0)))
    xp, B_eff = maybe_pad_batch(xp, tb)
    grid = (_cdiv(B_eff, tb), D_pad // tk)

    vmem_limit = int(min(limit_cap,
                         max(32 * 1024 * 1024,
                             _vmem_bytes_ktiled(tb, tk, x_item)
                             + 8 * 1024 * 1024)))
    cost = pl.CostEstimate(
        flops=int(2 * B_eff * D_pad * H_PAD + 4 * B_eff * H_PAD),
        transcendentals=0,
        bytes_accessed=int(xp.size * x_item + w1k.size * 2
                           + (b1p.size + w2row.size + b2s.size) * 4
                           + B_eff * 4),
    )

    def call_k(single_buffer):
        def rspec(shape, imap):
            if single_buffer:
                return pl.BlockSpec(shape, imap, pipeline_mode=pl.Buffered(1))
            return pl.BlockSpec(shape, imap)

        in_specs = [
            pl.BlockSpec((tb, tk), lambda i, k: (i, k)),        # x: batch+K tiled
            pl.BlockSpec((tk, H_PAD), lambda i, k: (k, 0)),     # w1: K-streamed
            rspec((1, H_PAD), lambda i, k: (0, 0)),             # b1: resident
            rspec((1, H_PAD), lambda i, k: (0, 0)),             # w2 row: resident
            pl.BlockSpec(memory_space=pltpu.MemorySpace.SMEM),  # b2: scalar
        ]
        return pl.pallas_call(
            _disnet_kernel_ktiled,
            out_shape=jax.ShapeDtypeStruct((B_eff, 1), jnp.float32),
            grid=grid,
            in_specs=in_specs,
            out_specs=pl.BlockSpec((tb, 1), lambda i, k: (i, 0)),
            scratch_shapes=[pltpu.VMEM((tb, H_PAD), jnp.float32)],
            compiler_params=pltpu.CompilerParams(
                dimension_semantics=("parallel", "arbitrary"),
                vmem_limit_bytes=vmem_limit,
            ),
            cost_estimate=cost,
        )(xp, w1k, b1p, w2row, b2s)

    try:
        out = call_k(True)
    except Exception:
        out = call_k(False)
    return out[:B] if B_eff != B else out


# ----------------------------------------------------------------------------
# Params / reference
# ----------------------------------------------------------------------------
def init_params(key, dim_in):
    """Deterministic init mimicking PyTorch nn.Linear (uniform +/- 1/sqrt(fan_in)).
    Weights stored transposed relative to PyTorch: (in_features, out_features)."""
    k1, k2, k3, k4 = jax.random.split(key, 4)
    bound1 = 1.0 / jnp.sqrt(dim_in)
    bound2 = 1.0 / jnp.sqrt(HIDDEN)
    w1 = jax.random.uniform(k1, (dim_in, HIDDEN), jnp.float32, -bound1, bound1)
    b1 = jax.random.uniform(k2, (1, HIDDEN), jnp.float32, -bound1, bound1)
    w2 = jax.random.uniform(k3, (HIDDEN, 1), jnp.float32, -bound2, bound2)
    b2 = jax.random.uniform(k4, (1, 1), jnp.float32, -bound2, bound2)
    return w1, b1, w2, b2


def disnet_reference(x, w1, b1, w2, b2):
    # Mirrors the kernel's numerics: fc1 inputs rounded to bf16, f32 math after.
    xb = x.astype(jnp.bfloat16).astype(jnp.float32)
    w1b = w1.astype(jnp.bfloat16).astype(jnp.float32)
    h = xb @ w1b + b1
    h = jnp.where(h > 0, h, NEG_SLOPE * h)
    return h @ w2 + b2


if __name__ == "__main__":
    key = jax.random.PRNGKey(0)
    k_x, k_p, k_x2, k_p2 = jax.random.split(key, 4)

    # Test 1: small shapes, flat path.  The megacore rule splits B=20 into two
    # 16-row grid steps (ragged last tile handled by Pallas, no batch padding).
    batch, dim_in = 20, 32
    x = jax.random.normal(k_x, (batch, dim_in), jnp.float32)
    w1, b1, w2, b2 = init_params(k_p, dim_in)
    out = jax.block_until_ready(disnet_forward(x, w1, b1, w2, b2))
    ref = disnet_reference(x, w1, b1, w2, b2)
    assert out.shape == (batch, 1)
    assert jnp.allclose(out, ref, atol=1e-3, rtol=1e-3)

    # Test 2: force the K-tiled (dim_in-chunked) path at small shapes
    # (dim_in=200 with k_block=128 -> 2 K-steps, 2 batch steps).
    batch2, dim_in2 = 24, 200
    x2 = jax.random.normal(k_x2, (batch2, dim_in2), jnp.float32)
    w1b, b1b, w2b, b2b = init_params(k_p2, dim_in2)
    out2 = jax.block_until_ready(
        disnet_forward(x2, w1b, b1b, w2b, b2b, block_b=16, k_block=128))
    ref2 = disnet_reference(x2, w1b, b1b, w2b, b2b)
    assert out2.shape == (batch2, 1)
    assert jnp.allclose(out2, ref2, atol=1e-3, rtol=1e-3)

    print("KERNEL_OK")
</pallas_src>

<mosaic_0001>
module attributes {stable_mosaic.version = 11 : i64} {
  func.func @_disnet_kernel(%arg0: i32, %arg1: memref<16x32xf32, #tpu.memory_space<vmem>>, %arg2: memref<32x256xbf16, #tpu.memory_space<vmem>>, %arg3: memref<1x256xf32, #tpu.memory_space<vmem>>, %arg4: memref<1x256xf32, #tpu.memory_space<vmem>>, %arg5: memref<1x1xf32, #tpu.memory_space<smem>>, %arg6: memref<16x1xf32, #tpu.memory_space<vmem>>) attributes {dimension_semantics = [#tpu.dimension_semantics<parallel>], iteration_bounds = array<i64: 2>, scalar_prefetch = 0 : i64, scratch_operands = 0 : i64, tpu.core_type = #tpu.core_type<tc>, window_params = [{transform_indices = @transform_0, window_bounds = array<i64: 16, 32>}, {pipeline_mode = #tpu.pipeline_mode<synchronous>, transform_indices = @transform_1, window_bounds = array<i64: 32, 256>}, {pipeline_mode = #tpu.pipeline_mode<synchronous>, transform_indices = @transform_2, window_bounds = array<i64: 1, 256>}, {pipeline_mode = #tpu.pipeline_mode<synchronous>, transform_indices = @transform_3, window_bounds = array<i64: 1, 256>}, {transform_indices = @transform_4, window_bounds = array<i64: 1, 1>}, {transform_indices = @transform_5, window_bounds = array<i64: 16, 1>}]} {
    %c0 = arith.constant 0 : index
    %c0_0 = arith.constant 0 : index
    %0 = vector.load %arg1[%c0, %c0_0] : memref<16x32xf32, #tpu.memory_space<vmem>>, vector<16x32xf32>
    %1 = arith.truncf %0 : vector<16x32xf32> to vector<16x32xbf16>
    %c0_1 = arith.constant 0 : index
    %c0_2 = arith.constant 0 : index
    %2 = vector.load %arg2[%c0_1, %c0_2] : memref<32x256xbf16, #tpu.memory_space<vmem>>, vector<32x256xbf16>
    %cst = arith.constant dense<0.000000e+00> : vector<16x256xf32>
    %3 = tpu.matmul %1, %2, %cst {dimension_numbers = #tpu.dot_dimension_numbers<[1], [0], [0], [1], [0, 0, 1, 1], [], []>} : vector<16x32xbf16>, vector<32x256xbf16>, vector<16x256xf32> -> vector<16x256xf32>
    %c0_3 = arith.constant 0 : index
    %c0_4 = arith.constant 0 : index
    %4 = vector.load %arg3[%c0_3, %c0_4] : memref<1x256xf32, #tpu.memory_space<vmem>>, vector<1x256xf32>
    %5 = vector.broadcast %4 : vector<1x256xf32> to vector<16x256xf32>
    %6 = arith.addf %3, %5 : vector<16x256xf32>
    %cst_5 = arith.constant 0.00999999977 : f32
    %7 = vector.broadcast %cst_5 : f32 to vector<16x256xf32>
    %8 = arith.mulf %7, %6 : vector<16x256xf32>
    %9 = arith.maximumf %6, %8 : vector<16x256xf32>
    %c0_6 = arith.constant 0 : index
    %c0_7 = arith.constant 0 : index
    %10 = vector.load %arg4[%c0_6, %c0_7] : memref<1x256xf32, #tpu.memory_space<vmem>>, vector<1x256xf32>
    %11 = vector.broadcast %10 : vector<1x256xf32> to vector<16x256xf32>
    %12 = arith.mulf %9, %11 : vector<16x256xf32>
    %cst_8 = arith.constant dense<0.000000e+00> : vector<16xf32>
    %13 = vector.multi_reduction <add>, %12, %cst_8 [1] : vector<16x256xf32> to vector<16xf32>
    %14 = vector.shape_cast %13 : vector<16xf32> to vector<16x1xf32>
    %c0_9 = arith.constant 0 : index
    %c0_10 = arith.constant 0 : index
    %15 = memref.load %arg5[%c0_9, %c0_10] : memref<1x1xf32, #tpu.memory_space<smem>>
    %16 = vector.broadcast %15 : f32 to vector<16x1xf32>
    %17 = arith.addf %14, %16 : vector<16x1xf32>
    %c0_11 = arith.constant 0 : index
    %c0_12 = arith.constant 0 : index
    %18 = vector.load %arg6[%c0_11, %c0_12] : memref<16x1xf32, #tpu.memory_space<vmem>>, vector<16x1xf32>
    tpu.vector_store %arg6[%c0_11, %c0_12], %17 {strides = array<i32>} : memref<16x1xf32, #tpu.memory_space<vmem>>, vector<16x1xf32>,
    return
  }
  func.func @transform_0(%arg0: i32) -> (i32, i32) {
    %c0_i32 = arith.constant 0 : i32
    %c0_i32_0 = arith.constant 0 : i32
    return %arg0, %c0_i32 : i32, i32
  }
  func.func @transform_1(%arg0: i32) -> (i32, i32) {
    %c0_i32 = arith.constant 0 : i32
    %c0_i32_0 = arith.constant 0 : i32
    %c0_i32_1 = arith.constant 0 : i32
    return %c0_i32, %c0_i32_0 : i32, i32
  }
  func.func @transform_2(%arg0: i32) -> (i32, i32) {
    %c0_i32 = arith.constant 0 : i32
    %c0_i32_0 = arith.constant 0 : i32
    %c0_i32_1 = arith.constant 0 : i32
    return %c0_i32, %c0_i32_0 : i32, i32
  }
  func.func @transform_3(%arg0: i32) -> (i32, i32) {
    %c0_i32 = arith.constant 0 : i32
    %c0_i32_0 = arith.constant 0 : i32
    %c0_i32_1 = arith.constant 0 : i32
    return %c0_i32, %c0_i32_0 : i32, i32
  }
  func.func @transform_4(%arg0: i32) -> (i32, i32) {
    %c0_i32 = arith.constant 0 : i32
    %c0_i32_0 = arith.constant 0 : i32
    %c0_i32_1 = arith.constant 0 : i32
    return %c0_i32, %c0_i32_0 : i32, i32
  }
  func.func @transform_5(%arg0: i32) -> (i32, i32) {
    %c0_i32 = arith.constant 0 : i32
    %c0_i32_0 = arith.constant 0 : i32
    return %arg0, %c0_i32 : i32, i32
  }
}

module attributes {stable_mosaic.version = 11 : i64} {
  func.func @_disnet_kernel(%arg0: i32, %arg1: memref<16x32xf32, #tpu.memory_space<vmem>>, %arg2: memref<32x256xbf16, #tpu.memory_space<vmem>>, %arg3: memref<1x256xf32, #tpu.memory_space<vmem>>, %arg4: memref<1x256xf32, #tpu.memory_space<vmem>>, %arg5: memref<1x1xf32, #tpu.memory_space<smem>>, %arg6: memref<16x1xf32, #tpu.memory_space<vmem>>) attributes {dimension_semantics = [#tpu.dimension_semantics<parallel>], iteration_bounds = array<i64: 2>, scalar_prefetch = 0 : i64, scratch_operands = 0 : i64, tpu.core_type = #tpu.core_type<tc>, window_params = [{transform_indices = @transform_0, window_bounds = array<i64: 16, 32>}, {pipeline_mode = #tpu.pipeline_mode<synchronous>, transform_indices = @transform_1, window_bounds = array<i64: 32, 256>}, {pipeline_mode = #tpu.pipeline_mode<synchronous>, transform_indices = @transform_2, window_bounds = array<i64: 1, 256>}, {pipeline_mode = #tpu.pipeline_mode<synchronous>, transform_indices = @transform_3, window_bounds = array<i64: 1, 256>}, {transform_indices = @transform_4, window_bounds = array<i64: 1, 1>}, {transform_indices = @transform_5, window_bounds = array<i64: 16, 1>}]} {
    %c0 = arith.constant 0 : index
    %c0_0 = arith.constant 0 : index
    %0 = vector.load %arg1[%c0, %c0_0] : memref<16x32xf32, #tpu.memory_space<vmem>>, vector<16x32xf32>
    %1 = arith.truncf %0 : vector<16x32xf32> to vector<16x32xbf16>
    %c0_1 = arith.constant 0 : index
    %c0_2 = arith.constant 0 : index
    %2 = vector.load %arg2[%c0_1, %c0_2] : memref<32x256xbf16, #tpu.memory_space<vmem>>, vector<32x256xbf16>
    %cst = arith.constant dense<0.000000e+00> : vector<16x256xf32>
    %3 = tpu.matmul %1, %2, %cst {dimension_numbers = #tpu.dot_dimension_numbers<[1], [0], [0], [1], [0, 0, 1, 1], [], []>} : vector<16x32xbf16>, vector<32x256xbf16>, vector<16x256xf32> -> vector<16x256xf32>
    %c0_3 = arith.constant 0 : index
    %c0_4 = arith.constant 0 : index
    %4 = vector.load %arg3[%c0_3, %c0_4] : memref<1x256xf32, #tpu.memory_space<vmem>>, vector<1x256xf32>
    %5 = vector.broadcast %4 : vector<1x256xf32> to vector<16x256xf32>
    %6 = arith.addf %3, %5 : vector<16x256xf32>
    %cst_5 = arith.constant 0.00999999977 : f32
    %7 = vector.broadcast %cst_5 : f32 to vector<16x256xf32>
    %8 = arith.mulf %7, %6 : vector<16x256xf32>
    %9 = arith.maximumf %6, %8 : vector<16x256xf32>
    %c0_6 = arith.constant 0 : index
    %c0_7 = arith.constant 0 : index
    %10 = vector.load %arg4[%c0_6, %c0_7] : memref<1x256xf32, #tpu.memory_space<vmem>>, vector<1x256xf32>
    %11 = vector.broadcast %10 : vector<1x256xf32> to vector<16x256xf32>
    %12 = arith.mulf %9, %11 : vector<16x256xf32>
    %cst_8 = arith.constant dense<0.000000e+00> : vector<16xf32>
    %13 = vector.multi_reduction <add>, %12, %cst_8 [1] : vector<16x256xf32> to vector<16xf32>
    %14 = vector.shape_cast %13 : vector<16xf32> to vector<16x1xf32>
    %c0_9 = arith.constant 0 : index
    %c0_10 = arith.constant 0 : index
    %15 = memref.load %arg5[%c0_9, %c0_10] : memref<1x1xf32, #tpu.memory_space<smem>>
    %16 = vector.broadcast %15 : f32 to vector<16x1xf32>
    %17 = arith.addf %14, %16 : vector<16x1xf32>
    %c0_11 = arith.constant 0 : index
    %c0_12 = arith.constant 0 : index
    %18 = vector.load %arg6[%c0_11, %c0_12] : memref<16x1xf32, #tpu.memory_space<vmem>>, vector<16x1xf32>
    tpu.vector_store %arg6[%c0_11, %c0_12], %17 {strides = array<i32>} : memref<16x1xf32, #tpu.memory_space<vmem>>, vector<16x1xf32>,
    return
  }
  func.func @transform_0(%arg0: i32) -> (i32, i32) {
    %c0_i32 = arith.constant 0 : i32
    %c0_i32_0 = arith.constant 0 : i32
    return %arg0, %c0_i32 : i32, i32
  }
  func.func @transform_1(%arg0: i32) -> (i32, i32) {
    %c0_i32 = arith.constant 0 : i32
    %c0_i32_0 = arith.constant 0 : i32
    %c0_i32_1 = arith.constant 0 : i32
    return %c0_i32, %c0_i32_0 : i32, i32
  }
  func.func @transform_2(%arg0: i32) -> (i32, i32) {
    %c0_i32 = arith.constant 0 : i32
    %c0_i32_0 = arith.constant 0 : i32
    %c0_i32_1 = arith.constant 0 : i32
    return %c0_i32, %c0_i32_0 : i32, i32
  }
  func.func @transform_3(%arg0: i32) -> (i32, i32) {
    %c0_i32 = arith.constant 0 : i32
    %c0_i32_0 = arith.constant 0 : i32
    %c0_i32_1 = arith.constant 0 : i32
    return %c0_i32, %c0_i32_0 : i32, i32
  }
  func.func @transform_4(%arg0: i32) -> (i32, i32) {
    %c0_i32 = arith.constant 0 : i32
    %c0_i32_0 = arith.constant 0 : i32
    %c0_i32_1 = arith.constant 0 : i32
    return %c0_i32, %c0_i32_0 : i32, i32
  }
  func.func @transform_5(%arg0: i32) -> (i32, i32) {
    %c0_i32 = arith.constant 0 : i32
    %c0_i32_0 = arith.constant 0 : i32
    return %arg0, %c0_i32 : i32, i32
  }
}

</mosaic_0001>

<bundles_post_ra>
// kernel: tpu_custom_call.1
= control target key start
LH: loop header
LB: loop body
LE: loop exit
PB: predicated region body
PF: predicated region fallthrough
CT: control target
= control target key end

     0   :  { %s1189_s0 = inlined_call_operand.hbm [shape: f32[20,32], index: 0, kind: input, shape index: {}]   ;;  %s1190_s1 = inlined_call_operand.hbm [shape: bf16[32,256], index: 1, kind: input, shape index: {}]   ;;  %s1191_s2 = inlined_call_operand.vmem [shape: f32[1,256], index: 2, kind: input, shape index: {}]   ;;  %s1192_s3 = inlined_call_operand.vmem [shape: f32[1,256], index: 3, kind: input, shape index: {}]   ;;  %s1193_s4 = inlined_call_operand.<no memory space> [shape: f32[1,1], index: 4, kind: input, shape index: {}]   ;;  %s1194_s5 = inlined_call_operand.vmem [shape: f32[20,1], index: 5, kind: output, shape index: {}]  }
   0x1   :  { %10 = sst [smem:[#allocation2]] %s1193_s4 }
   0x2   :  { %11 = vsyncpa [#allocation4], 0 }
   0x3   :  { %13 = vsyncpa [#allocation4 + $0x1], 0 }
   0x4   :  { %14 = vsyncpa [#allocation6], 0  ;;  %s995_s20 = smov 0   ;;  %s997_s21 = smov 0  }
   0x5   :  { %s999_s22 = smov 0   ;;  %s1001_s23 = smov 0  }
   0x6 LB: > { %s1014_s4 = sadd.s32 4294967295, %s921_s23   ;;  %s1017_s24 = sadd.s32 1, %s921_s23   ;;  %s921_s23 = sphi %s1001_s23, %s1212_s23   ;;  %s917_s22 = sphi %s999_s22, %s1211_s22   ;;  %s913_s21 = sphi %s997_s21, %s1210_s21   ;;  %s909_s20 = sphi %s995_s20, %s1209_s20  }
   0x7   : > { %s24_s25 = ssub.s32 %s921_s23, %s1017_s24  ;;  %s27_s26 = sadd.s32 1, %s917_s22 }
   0x8   : > { %p25_p0 = scmp.eq.s32.totalorder %s24_s25, 0  ;;  %p34_p1 = scmp.ne.s32.totalorder %s917_s22, %s913_s21 }
   0x9   : > { %p35_p2 = scmp.eq.s32.totalorder %s921_s23, 0  ;;  %p40_p3 = scmp.ne.s32.totalorder %s913_s21, %s909_s20 }
   0xa   : > { %s1027_s27 = scalar_select %p25_p0, %s917_s22, %s27_s26  }
   0xb   : > { %p1029_p4 = por %p35_p2, %p34_p1  ;;  %p1195_p5 = scmp.eq.s32.totalorder %s1014_s4, 0 }
   0xc   : > { %p148_p6 = scmp.eq.s32.totalorder %s1014_s4, 1  ;;  %p636_p7 = scmp.ge.s32.totalorder %s921_s23, 1 }
   0xd   : > { %s1198_s28 = scalar_select %p1029_p4, 1, 0 }
   0xe   : > { %p1038_p8 = por %p1195_p5, %p40_p3  ;;  %p161_p9 = scmp.lt.s32.totalorder %s921_s23, 3 }
   0xf   : > { %p1043_p10 = por %p148_p6, %p34_p1  ;;  %s955_s7 = smov [#allocation5]  }
  0x10   : > { %s1199_s29 = scalar_select %p1038_p8, 1, 0 }
  0x11   : > { %s1200_s30 = scalar_select %p1043_p10, 1, 0 }
  0x12   : > { %p1047_p11 = pnand %p636_p7, %p161_p9  ;;  %s173_s8 = sshll.u32 %s955_s7, 4  ;;  %s174_s8 = int_to_ptr.vmem [resolvable:$true] %s173_s8 }
  0x13   : > { %s795_s12 = scalar_lea.hbm %s1190_s1, 512 }
  0x14   : > { %s1201_s6 = scalar_select %p1047_p11, 1, 0 }
  0x15   : > { %p681_p12 = pneg %p1047_p11  ;;  %p796_p0 = scmp.ne.s32.totalorder %s1190_s1, %s795_s12 }
  0x16   : > { %p802_p6 = scmp.lt.u32.totalorder %s795_s12, %s1190_s1 }
  0x17   : > { %p1055_p13 = pnand %p681_p12, %p1195_p5 }
  0x19   : > { %p797_p1 = pneg %p1055_p13 }
  0x1b   : > { %p798_p2 = pnand %p797_p1, %p796_p0 }
  0x1d   : > { %p799_p3 = pneg %p798_p2 }
  0x1f   : > { %p804_p7 = pnand %p802_p6, %p799_p3 }
  0x21   : > { %807 = shalt.err (!%p804_p7)
}
  0x22   : > { %s808_s17 = scalar_lea.vmem %s174_s8, 512  ;;  %p816_p10 = scmp.lt.s32.totalorder %s174_s8, %s174_s8 }
  0x23   : > { %p809_p9 = scmp.ne.s32.totalorder %s174_s8, %s808_s17  ;;  %p817_p8 = scmp.lt.s32.totalorder %s808_s17, %s808_s17 }
  0x25   : > { %p811_p12 = pnand %p809_p9, %p797_p1  ;;  %p818_p11 = por %p817_p8, %p816_p10 }
  0x27   : > { %p812_p5 = pneg %p811_p12 }
  0x29   : > { %p819_p4 = pnand %p818_p11, %p812_p5 }
  0x2b   : > { %822 = shalt.err (!%p819_p4)
}
  0x2c   : > { %s956_s18 = smov 128   ;;  %s957_s19 = smov 8  }
  0x2d   : > { %684 = dma.hbm_to_vmem [thread:$0]  (!%p1055_p13), %s1190_s1, 512, %s174_s8, [#allocation6], %s956_s18, %s956_s18, %s957_s19  }
  0x2e   : > { %p638_p0 = scmp.ge.s32.totalorder %s921_s23, 2 }
  0x2f   : > { %p1203_p2 = scmp.ne.s32.totalorder (!%p638_p0), %s1198_s28, 0 }
  0x30   : > { %192 = sbr.rel (%p638_p0) target bundleno = 90 (0x5a), region = 32 }
  0x37   : > { %195 = sbr.rel (!%p1203_p2) target bundleno = 90 (0x5a), region = 36  ;;  %s196_s26 = sand.u32 (%p1203_p2), 1, %s917_s22  }
  0x38   : > { %s640_s7 = sshll.u32 (%p1203_p2), %s921_s23, 1  ;;  %s639_s10 = sshll.u32 (%p1203_p2), %s196_s26, 4 }
  0x39   : > { %s202_s11 = ssub.s32 (%p1203_p2), 3, %s640_s7  ;;  %s1083_s13 = scalar_lea.sflag (%p1203_p2), [#allocation4], %s196_s26 }
  0x3a   : > { %p203_p4 = scmp.lt.s32.totalorder (%p1203_p2), %s202_s11, 2  ;;  %s200_s8 = scalar_lea.vmem (%p1203_p2), [#allocation3], %s639_s10 }
  0x3e   : > { %s1214_s11 = smov (!%p203_p4, %s202_s11), 2 }
  0x3f   : > { %s1080_s12 = sshll.u32 %s1214_s11, 7 }
  0x40   : > { %s207_s9 = ssub.s32 256, %s1080_s12 }
  0x41   : > { %208 = vsyncadd %s1083_s13, %s207_s9  ;;  %p642_p5 = scmp.ne.s32.totalorder %s1080_s12, 0  ;;  %s672_s28 = sshll.u32 %s921_s23, 8 }
  0x42   : > { %s1091_s16 = scalar_lea.hbm %s1189_s0, %s672_s28  ;;  %s213_s17 = sshll.u32 %s200_s8, 4  ;;  %s1093_s17 = int_to_ptr.vmem [resolvable:$true] %s213_s17 }
  0x43   : > { %s823_s18 = scalar_lea.hbm %s1091_s16, %s1080_s12  ;;  %s827_s23 = scalar_lea.hbm %s1189_s0, 384 }
  0x44   : > { %p824_p8 = scmp.ne.s32.totalorder %s1091_s16, %s823_s18  ;;  %p828_p13 = scmp.lt.u32.totalorder %s1091_s16, %s1189_s0 }
  0x45   : > { %p829_p1 = scmp.lt.u32.totalorder %s827_s23, %s823_s18  ;;  %p831_p6 = scmp.lt.u32.totalorder %s823_s18, %s1091_s16 }
  0x46   : > { %p825_p10 = pnand %p824_p8, %p642_p5 }
  0x47   : > { %p830_p3 = por %p829_p1, %p828_p13 }
  0x48   : > { %p826_p11 = pneg %p825_p10 }
  0x49   : > { %p832_p7 = por %p831_p6, %p830_p3 }
  0x4b   : > { %p833_p9 = pnand %p832_p7, %p826_p11 }
  0x4d   : > { %836 = shalt.err (!%p833_p9)
}
  0x4e   : > { %s837_s7 = scalar_lea.vmem %s1093_s17, %s1080_s12  ;;  %s958_s10 = smov [#allocation3]  }
  0x4f   : > { %p838_p12 = scmp.ne.s32.totalorder %s1093_s17, %s837_s7  ;;  %s841_s11 = sshll.u32 %s958_s10, 4  ;;  %s842_s11 = int_to_ptr.vmem [resolvable:$false] %s841_s11 }
  0x50   : > { %s843_s9 = scalar_lea.vmem %s842_s11, 512  ;;  %p844_p4 = scmp.lt.s32.totalorder %s1093_s17, %s842_s11 }
  0x51   : > { %p839_p0 = pnand %p838_p12, %p642_p5  ;;  %p845_p8 = scmp.lt.s32.totalorder %s843_s9, %s837_s7 }
  0x53   : > { %p840_p2 = pneg %p839_p0  ;;  %p846_p10 = por %p845_p8, %p844_p4 }
  0x55   : > { %p847_p13 = pnand %p846_p10, %p840_p2 }
  0x57   : > { %850 = shalt.err (!%p847_p13)
}
  0x58   : > { %s959_s8 = smov 128   ;;  %s960_s28 = smov 8  }
  0x59   : > { %219 = dma.hbm_to_vmem [thread:$0]  (%p642_p5), %s1091_s16, %s1080_s12, %s1093_s17, %s1083_s13, %s959_s8, %s959_s8, %s960_s28  }
  0x5a PF: > { %p1204_p11 = scmp.ne.s32.totalorder %s1201_s6, 0 }
  0x5b   : > { %s227_s14 = sand.u32 (!%p1204_p11), 1, %s913_s21   ;;  %p1205_p1 = scmp.ne.s32.totalorder (!%p1204_p11), %s1199_s29, 0 }
  0x5c   : > { %225 = sbr.rel (%p1204_p11) target bundleno = 533 (0x215), region = 40  ;;  %s1123_s15 = sshll.u32 (!%p1204_p11), %s227_s14, 4 }
  0x5d   : > { %s228_s18 = scalar_lea.sflag (!%p1204_p11), [#allocation4], %s227_s14  ;;  %s231_s19 = scalar_lea.vmem (!%p1204_p11), [#allocation3], %s1123_s15 }
  0x63   : > { %900 = dma.done.wait (%p1205_p1), %s228_s18, 256  }
  0x64   : > { %902 = vsyncadd (%p1205_p1), %s228_s18, 4294967040  ;;  %p1206_p5 = scmp.eq.s32.totalorder %s1014_s4, 0 }
  0x66   : > { %904 = dma.done.wait (%p1206_p5), [#allocation6], 512   ;;  %p1207_p3 = pmov %p1206_p5 }
  0x67   : > { %v961_v0 = vmov 0   ;;  %v789_v1 = vld [vmem:[#allocation5 + $0x4] ss:$8 sps:$4 sm:$0xff]   ;;  %v791_v2 = vld [vmem:[#allocation5] ss:$8 sps:$4 sm:$0xff]   ;;  %vm311_vm0 = vcmask 261120   ;;  %v281_v8 = vlaneseq }
  0x68   : > { %906 = vsyncadd (%p1207_p3), [#allocation6], 4294966784  ;;  %347 = vmatprep.mubr.bf16.mxu0 %v961_v0  ;;  %315 = vmatprep.subr.bf16.mxu0 %v789_v1  ;;  %v792_v3 = vld [vmem:[#allocation5 + $0x14] ss:$8 sps:$4 sm:$0xff]   ;;  %v794_v4 = vld [vmem:[#allocation5 + $0x10] ss:$8 sps:$4 sm:$0xff]  }
  0x69   : > { %316 = vmatpush1.bf16.msra.mxu0 %v791_v2  ;;  %v272_v5 = vld [vmem:[%s231_s19] sm:$0xff]  ;;  %v273_v6 = vld [vmem:[%s231_s19 + $0x8] sm:$0xff]  ;;  %v282_v9 = vshrl.u32 %v281_v8, 7  ;;  %s388_s16 = sld [smem:[#allocation2]]  ;;  %vm392_vm1 = vcmask 7168   ;;  %s1141_s17 = scalar_lea.vmem [#allocation7], %s1123_s15  }
  0x6a   : > { %317 = vmatprep.subr.bf16.mxu0 %v792_v3  ;;  %v274_v7 = vpack.c.bf16 %v273_v6, %v272_v5  ;;  %v279_v11 = vld [vmem:[%s1191_s2] sm:$0x3]  ;;  %p1208_p6 = scmp.ne.s32.totalorder %s1200_s30, 0 }
  0x6b   : > { %v283_v10 = vsub.s32 0, %v282_v9  ;;  %v287_v12 = vsub.s32 1, %v282_v9  ;;  %v366_v16 = vld [vmem:[%s1192_s3] sm:$0x3]  ;;  %s656_s20 = sshll.u32 (%p1208_p6), %s1014_s4, 1  ;;  %s673_s23 = sshll.u32 (%p1208_p6), %s1014_s4, 4 }
  0x6c   : > { %s403_s25 = ssub.s32 (%p1208_p6), 3, %s656_s20  ;;  %s1152_s10 = scalar_lea.vmem (%p1208_p6), %s1194_s5, %s673_s23  }
  0x6d   : > { %318 = vmatpush1.bf16.msra.mxu0 %v794_v4  ;;  %v284_v13 = vrot.slane %v279_v11, %v283_v10  ;;  %v288_v14 = vrot.slane %v279_v11, %v287_v12  ;;  %v371_v24 = vrot.slane %v366_v16, %v283_v10  ;;  %v375_v27 = vrot.slane %v366_v16, %v287_v12  ;;  %p404_p7 = scmp.lt.s32.totalorder (%p1208_p6), %s403_s25, 2 }
  0x6f   : > { %v389_v40 = vstv %s388_s16 }
  0x70   : > { %654 = vmatmul.mubr.msk.bf16.vlgmr.msra.gmra.mrb[0].mxu0 %vm311_vm0, %v274_v7 }
 0x143   : > { %v349_v15 = vpop.f32.mrb[0].mxu0 }
 0x144   : > { %v350_v17 = vadd.f32 %v349_v15, %v284_v13  ;;  %v351_v18 = vpop.f32.mrb[1].mxu0 }
 0x145   : > { %v352_v19 = vadd.f32 %v351_v18, %v288_v14  ;;  %v353_v20 = vpop.f32.mrb[2].mxu0 }
 0x146   : > { %v358_v21 = vmul.f32 0.01, %v350_v17  ;;  %v354_v22 = vadd.f32 %v353_v20, %v284_v13  ;;  %v355_v23 = vpop.f32.mrb[3].mxu0 }
 0x147   : > { %v359_v25 = vmul.f32 0.01, %v352_v19  ;;  %v356_v26 = vadd.f32 %v355_v23, %v288_v14 }
 0x148   : > { %v362_v28 = vmax.f32 %v350_v17, %v358_v21  ;;  %v360_v29 = vmul.f32 0.01, %v354_v22 }
 0x149   : > { %v363_v30 = vmax.f32 %v352_v19, %v359_v25  ;;  %v361_v31 = vmul.f32 0.01, %v356_v26 }
 0x14a   : > { %v364_v32 = vmax.f32 %v354_v22, %v360_v29  ;;  %v378_v33 = vmul.f32 %v371_v24, %v362_v28 }
 0x14b   : > { %v365_v34 = vmax.f32 %v356_v26, %v361_v31  ;;  %v379_v35 = vmul.f32 %v375_v27, %v363_v30 }
 0x14c   : > { %v380_v36 = vmul.f32 %v371_v24, %v364_v32 }
 0x14d   : > { %v382_v37 = vadd.f32 %v379_v35, %v378_v33  ;;  %v381_v38 = vmul.f32 %v375_v27, %v365_v34 }
 0x14f   : > { %383 = vadd.xlane.f32.xlu0 %v382_v37  ;;  %v385_v39 = vadd.f32 %v381_v38, %v380_v36 }
 0x153   : > { %386 = vadd.xlane.f32.xlu0 %v385_v39 }
 0x1dc   : > { %v384_v41 = vpop.xlane.xlu0 %383 }
 0x1dd   : > { %v390_v42 = vadd.f32 %v389_v40, %v384_v41  ;;  %401 = sbr.rel (!%p1208_p6) target bundleno = 533 (0x215), region = 52 }
 0x1df   : > { %393 = vst.msk [vmem:[%s1141_s17] sm:$0xff] %vm392_vm1, %v390_v42 }
 0x1e0   : > { %v387_v43 = vpop.xlane.xlu0 %386 }
 0x1e1   : > { %v391_v44 = vadd.f32 %v389_v40, %v387_v43 }
 0x1e3   : > { %394 = vst.msk [vmem:[%s1141_s17 + $0x8] sm:$0xff] %vm392_vm1, %v391_v44 }
 0x1e4   : > { %s1216_s25 = smov (!%p404_p7, %s403_s25), 2 }
 0x1e5   : > { %s657_s11 = sshll.u32 %s1216_s25, 7 }
 0x1e6   : > { %p660_p9 = scmp.eq.s32.totalorder %s657_s11, 0 }
 0x1e7   : > { %s1158_s30 = sshrl.u32 (!%p660_p9), %s1216_s25, 1 }
 0x1e8   : > { %412 = sbr.rel (%p660_p9) target bundleno = 533 (0x215), region = 56  ;;  %p661_p12 = scmp.le.s32.totalorder (!%p660_p9), %s1158_s30, 0 }
 0x1ef   : > { %579 = sbr.rel (%p661_p12) target bundleno = 512 (0x200), region = 138  ;;  %s923_s4 = smov (!%p661_p12), %s1152_s10  }
 0x1f0   : > { %s927_s9 = smov (!%p661_p12), %s1141_s17   ;;  %s931_s8 = smov (!%p661_p12), 0  }
 0x1f1   : > { %s935_s28 = smov (!%p661_p12), 0  }
 0x1f6 LB: >> { %v476_v45 = vld [vmem:[%s929_s9] sm:$0xff]  ;;  %v478_v46 = vld [vmem:[%s929_s9 + $0x8] sm:$0xff]  ;;  %s480_s14 = sadd.s32 1, %s933_s8  ;;  %s470_s28 = sadd.s32 1, %s937_s28   ;;  %s937_s28 = sphi %s935_s28, %s470_s28   ;;  %s933_s8 = sphi %s931_s8, %s932_s8   ;;  %s929_s9 = sphi %s927_s9, %s485_s9   ;;  %s925_s4 = sphi %s923_s4, %s486_s4  }
 0x1f7   : >> { %477 = vst [vmem:[%s925_s4] sm:$0xff] %v476_v45  ;;  %479 = vst [vmem:[%s925_s4 + $0x8] sm:$0xff] %v478_v46  ;;  %p481_p0 = scmp.ge.s32.totalorder %s480_s14, %s1158_s30  ;;  %p469_p2 = scmp.ge.s32.totalorder %s470_s28, %s1158_s30 }
 0x1f9   : >> { %s1218_s14 = smov (%p481_p0, %s480_s14), 0  ;;  %472 = sbr.rel (!%p469_p2) target bundleno = 502 (0x1f6), region = 144 }
 0x1fa   : >> { %s662_s15 = sshll.u32 %s1218_s14, 4  ;;  %s932_s8 = smov %s1218_s14  }
 0x1fb   : >> { %s485_s9 = scalar_lea.vmem %s1141_s17, %s662_s15 [#allocation7]   ;;  %s486_s4 = scalar_lea.vmem %s1152_s10, %s662_s15  }
 0x200 PF: > { %s1168_s18 = sand.u32 1, %s1216_s25   ;;  %s674_s19 = sshll.u32 %s1158_s30, 4 }
 0x201   : > { %s491_s29 = scalar_lea.vmem %s1141_s17, %s674_s19 [#allocation7]   ;;  %s493_s6 = scalar_lea.vmem %s1152_s10, %s674_s19  }
 0x202   : > { %p667_p4 = scmp.le.s32.totalorder %s1168_s18, 0 }
 0x203   : > { %s939_s12 = smov (!%p667_p4), %s493_s6   ;;  %s943_s13 = smov (!%p667_p4), %s491_s29  }
 0x204   : > { %593 = sbr.rel (%p667_p4) target bundleno = 533 (0x215), region = 149  ;;  %s947_s16 = smov (!%p667_p4), 0  }
 0x205   : > { %s951_s20 = smov (!%p667_p4), 0  }
 0x20b LB: >> { %v503_v47 = vld [vmem:[%s945_s13] sm:$0xff]  ;;  %s505_s23 = sadd.s32 1, %s949_s16  ;;  %s497_s20 = sadd.s32 1, %s953_s20   ;;  %s953_s20 = sphi %s951_s20, %s497_s20   ;;  %s949_s16 = sphi %s947_s16, %s948_s16   ;;  %s945_s13 = sphi %s943_s13, %s510_s13   ;;  %s941_s12 = sphi %s939_s12, %s511_s12  }
 0x20c   : >> { %504 = vst [vmem:[%s941_s12] sm:$0xff] %v503_v47  ;;  %p506_p8 = scmp.ge.s32.totalorder %s505_s23, %s1168_s18  ;;  %p496_p10 = scmp.ge.s32.totalorder %s497_s20, %s1168_s18 }
 0x20e   : >> { %s1220_s23 = smov (%p506_p8, %s505_s23), 0  ;;  %499 = sbr.rel (!%p496_p10) target bundleno = 523 (0x20b), region = 155 }
 0x20f   : >> { %s668_s17 = sshll.u32 %s1220_s23, 3  ;;  %s948_s16 = smov %s1220_s23  }
 0x210   : >> { %s510_s13 = scalar_lea.vmem %s491_s29, %s668_s17 [#allocation7]   ;;  %s511_s12 = scalar_lea.vmem %s493_s6, %s668_s17  }
 0x215 PF: > { %p17_p13 = scmp.ge.s32.totalorder %s1017_s24, 4   ;;  %s1209_s20 = smov %s913_s21 }
 0x216   : > { %s1210_s21 = smov %s917_s22  ;;  %s1211_s22 = smov %s1027_s27 }
 0x217   : > { %s1212_s23 = smov %s1017_s24  ;;  %19 = sbr.rel (!%p17_p13) target bundleno = 6 (0x6), region = 166 }
 0x21e   :  { %527 = vsyncpa [#allocation4], 1 }
 0x21f   :  { %529 = vsyncpa [#allocation4 + $0x1], 1 }
 0x220   :  { %530 = vsyncpa [#allocation6], 1 }

// kernel: tpu_custom_call.1
= control target key start
LH: loop header
LB: loop body
LE: loop exit
PB: predicated region body
PF: predicated region fallthrough
CT: control target
= control target key end

     0   :  { %s1189_s0 = inlined_call_operand.hbm [shape: f32[20,32], index: 0, kind: input, shape index: {}]   ;;  %s1190_s1 = inlined_call_operand.hbm [shape: bf16[32,256], index: 1, kind: input, shape index: {}]   ;;  %s1191_s2 = inlined_call_operand.vmem [shape: f32[1,256], index: 2, kind: input, shape index: {}]   ;;  %s1192_s3 = inlined_call_operand.vmem [shape: f32[1,256], index: 3, kind: input, shape index: {}]   ;;  %s1193_s4 = inlined_call_operand.<no memory space> [shape: f32[1,1], index: 4, kind: input, shape index: {}]   ;;  %s1194_s5 = inlined_call_operand.vmem [shape: f32[20,1], index: 5, kind: output, shape index: {}]  }
   0x1   :  { %10 = sst [smem:[#allocation2]] %s1193_s4 }
   0x2   :  { %11 = vsyncpa [#allocation4], 0 }
   0x3   :  { %13 = vsyncpa [#allocation4 + $0x1], 0 }
   0x4   :  { %14 = vsyncpa [#allocation6], 0  ;;  %s995_s20 = smov 0   ;;  %s997_s21 = smov 0  }
   0x5   :  { %s999_s22 = smov 0   ;;  %s1001_s23 = smov 0  }
   0x6 LB: > { %s1014_s4 = sadd.s32 4294967295, %s921_s23   ;;  %s1017_s24 = sadd.s32 1, %s921_s23   ;;  %s921_s23 = sphi %s1001_s23, %s1212_s23   ;;  %s917_s22 = sphi %s999_s22, %s1211_s22   ;;  %s913_s21 = sphi %s997_s21, %s1210_s21   ;;  %s909_s20 = sphi %s995_s20, %s1209_s20  }
   0x7   : > { %s24_s25 = ssub.s32 %s921_s23, %s1017_s24  ;;  %s27_s26 = sadd.s32 1, %s917_s22 }
   0x8   : > { %p25_p0 = scmp.eq.s32.totalorder %s24_s25, 0  ;;  %p34_p1 = scmp.ne.s32.totalorder %s917_s22, %s913_s21 }
   0x9   : > { %p35_p2 = scmp.eq.s32.totalorder %s921_s23, 0  ;;  %p40_p3 = scmp.ne.s32.totalorder %s913_s21, %s909_s20 }
   0xa   : > { %s1027_s27 = scalar_select %p25_p0, %s917_s22, %s27_s26  }
   0xb   : > { %p1029_p4 = por %p35_p2, %p34_p1  ;;  %p1195_p5 = scmp.eq.s32.totalorder %s1014_s4, 0 }
   0xc   : > { %p148_p6 = scmp.eq.s32.totalorder %s1014_s4, 1  ;;  %p636_p7 = scmp.ge.s32.totalorder %s921_s23, 1 }
   0xd   : > { %s1198_s28 = scalar_select %p1029_p4, 1, 0 }
   0xe   : > { %p1038_p8 = por %p1195_p5, %p40_p3  ;;  %p161_p9 = scmp.lt.s32.totalorder %s921_s23, 3 }
   0xf   : > { %p1043_p10 = por %p148_p6, %p34_p1  ;;  %s955_s7 = smov [#allocation5]  }
  0x10   : > { %s1199_s29 = scalar_select %p1038_p8, 1, 0 }
  0x11   : > { %s1200_s30 = scalar_select %p1043_p10, 1, 0 }
  0x12   : > { %p1047_p11 = pnand %p636_p7, %p161_p9  ;;  %s173_s8 = sshll.u32 %s955_s7, 4  ;;  %s174_s8 = int_to_ptr.vmem [resolvable:$true] %s173_s8 }
  0x13   : > { %s795_s12 = scalar_lea.hbm %s1190_s1, 512 }
  0x14   : > { %s1201_s6 = scalar_select %p1047_p11, 1, 0 }
  0x15   : > { %p681_p12 = pneg %p1047_p11  ;;  %p796_p0 = scmp.ne.s32.totalorder %s1190_s1, %s795_s12 }
  0x16   : > { %p802_p6 = scmp.lt.u32.totalorder %s795_s12, %s1190_s1 }
  0x17   : > { %p1055_p13 = pnand %p681_p12, %p1195_p5 }
  0x19   : > { %p797_p1 = pneg %p1055_p13 }
  0x1b   : > { %p798_p2 = pnand %p797_p1, %p796_p0 }
  0x1d   : > { %p799_p3 = pneg %p798_p2 }
  0x1f   : > { %p804_p7 = pnand %p802_p6, %p799_p3 }
  0x21   : > { %807 = shalt.err (!%p804_p7)
}
  0x22   : > { %s808_s17 = scalar_lea.vmem %s174_s8, 512  ;;  %p816_p10 = scmp.lt.s32.totalorder %s174_s8, %s174_s8 }
  0x23   : > { %p809_p9 = scmp.ne.s32.totalorder %s174_s8, %s808_s17  ;;  %p817_p8 = scmp.lt.s32.totalorder %s808_s17, %s808_s17 }
  0x25   : > { %p811_p12 = pnand %p809_p9, %p797_p1  ;;  %p818_p11 = por %p817_p8, %p816_p10 }
  0x27   : > { %p812_p5 = pneg %p811_p12 }
  0x29   : > { %p819_p4 = pnand %p818_p11, %p812_p5 }
  0x2b   : > { %822 = shalt.err (!%p819_p4)
}
  0x2c   : > { %s956_s18 = smov 128   ;;  %s957_s19 = smov 8  }
  0x2d   : > { %684 = dma.hbm_to_vmem [thread:$0]  (!%p1055_p13), %s1190_s1, 512, %s174_s8, [#allocation6], %s956_s18, %s956_s18, %s957_s19  }
  0x2e   : > { %p638_p0 = scmp.ge.s32.totalorder %s921_s23, 2 }
  0x2f   : > { %p1203_p2 = scmp.ne.s32.totalorder (!%p638_p0), %s1198_s28, 0 }
  0x30   : > { %192 = sbr.rel (%p638_p0) target bundleno = 90 (0x5a), region = 32 }
  0x37   : > { %195 = sbr.rel (!%p1203_p2) target bundleno = 90 (0x5a), region = 36  ;;  %s196_s26 = sand.u32 (%p1203_p2), 1, %s917_s22  }
  0x38   : > { %s640_s7 = sshll.u32 (%p1203_p2), %s921_s23, 1  ;;  %s639_s10 = sshll.u32 (%p1203_p2), %s196_s26, 4 }
  0x39   : > { %s202_s11 = ssub.s32 (%p1203_p2), 3, %s640_s7  ;;  %s1083_s13 = scalar_lea.sflag (%p1203_p2), [#allocation4], %s196_s26 }
  0x3a   : > { %p203_p4 = scmp.lt.s32.totalorder (%p1203_p2), %s202_s11, 2  ;;  %s200_s8 = scalar_lea.vmem (%p1203_p2), [#allocation3], %s639_s10 }
  0x3e   : > { %s1214_s11 = smov (!%p203_p4, %s202_s11), 2 }
  0x3f   : > { %s1080_s12 = sshll.u32 %s1214_s11, 7 }
  0x40   : > { %s207_s9 = ssub.s32 256, %s1080_s12 }
  0x41   : > { %208 = vsyncadd %s1083_s13, %s207_s9  ;;  %p642_p5 = scmp.ne.s32.totalorder %s1080_s12, 0  ;;  %s672_s28 = sshll.u32 %s921_s23, 8 }
  0x42   : > { %s1091_s16 = scalar_lea.hbm %s1189_s0, %s672_s28  ;;  %s213_s17 = sshll.u32 %s200_s8, 4  ;;  %s1093_s17 = int_to_ptr.vmem [resolvable:$true] %s213_s17 }
  0x43   : > { %s823_s18 = scalar_lea.hbm %s1091_s16, %s1080_s12  ;;  %s827_s23 = scalar_lea.hbm %s1189_s0, 384 }
  0x44   : > { %p824_p8 = scmp.ne.s32.totalorder %s1091_s16, %s823_s18  ;;  %p828_p13 = scmp.lt.u32.totalorder %s1091_s16, %s1189_s0 }
  0x45   : > { %p829_p1 = scmp.lt.u32.totalorder %s827_s23, %s823_s18  ;;  %p831_p6 = scmp.lt.u32.totalorder %s823_s18, %s1091_s16 }
  0x46   : > { %p825_p10 = pnand %p824_p8, %p642_p5 }
  0x47   : > { %p830_p3 = por %p829_p1, %p828_p13 }
  0x48   : > { %p826_p11 = pneg %p825_p10 }
  0x49   : > { %p832_p7 = por %p831_p6, %p830_p3 }
  0x4b   : > { %p833_p9 = pnand %p832_p7, %p826_p11 }
  0x4d   : > { %836 = shalt.err (!%p833_p9)
}
  0x4e   : > { %s837_s7 = scalar_lea.vmem %s1093_s17, %s1080_s12  ;;  %s958_s10 = smov [#allocation3]  }
  0x4f   : > { %p838_p12 = scmp.ne.s32.totalorder %s1093_s17, %s837_s7  ;;  %s841_s11 = sshll.u32 %s958_s10, 4  ;;  %s842_s11 = int_to_ptr.vmem [resolvable:$false] %s841_s11 }
  0x50   : > { %s843_s9 = scalar_lea.vmem %s842_s11, 512  ;;  %p844_p4 = scmp.lt.s32.totalorder %s1093_s17, %s842_s11 }
  0x51   : > { %p839_p0 = pnand %p838_p12, %p642_p5  ;;  %p845_p8 = scmp.lt.s32.totalorder %s843_s9, %s837_s7 }
  0x53   : > { %p840_p2 = pneg %p839_p0  ;;  %p846_p10 = por %p845_p8, %p844_p4 }
  0x55   : > { %p847_p13 = pnand %p846_p10, %p840_p2 }
  0x57   : > { %850 = shalt.err (!%p847_p13)
}
  0x58   : > { %s959_s8 = smov 128   ;;  %s960_s28 = smov 8  }
  0x59   : > { %219 = dma.hbm_to_vmem [thread:$0]  (%p642_p5), %s1091_s16, %s1080_s12, %s1093_s17, %s1083_s13, %s959_s8, %s959_s8, %s960_s28  }
  0x5a PF: > { %p1204_p11 = scmp.ne.s32.totalorder %s1201_s6, 0 }
  0x5b   : > { %s227_s14 = sand.u32 (!%p1204_p11), 1, %s913_s21   ;;  %p1205_p1 = scmp.ne.s32.totalorder (!%p1204_p11), %s1199_s29, 0 }
  0x5c   : > { %225 = sbr.rel (%p1204_p11) target bundleno = 533 (0x215), region = 40  ;;  %s1123_s15 = sshll.u32 (!%p1204_p11), %s227_s14, 4 }
  0x5d   : > { %s228_s18 = scalar_lea.sflag (!%p1204_p11), [#allocation4], %s227_s14  ;;  %s231_s19 = scalar_lea.vmem (!%p1204_p11), [#allocation3], %s1123_s15 }
  0x63   : > { %900 = dma.done.wait (%p1205_p1), %s228_s18, 256  }
  0x64   : > { %902 = vsyncadd (%p1205_p1), %s228_s18, 4294967040  ;;  %p1206_p5 = scmp.eq.s32.totalorder %s1014_s4, 0 }
  0x66   : > { %904 = dma.done.wait (%p1206_p5), [#allocation6], 512   ;;  %p1207_p3 = pmov %p1206_p5 }
  0x67   : > { %v961_v0 = vmov 0   ;;  %v789_v1 = vld [vmem:[#allocation5 + $0x4] ss:$8 sps:$4 sm:$0xff]   ;;  %v791_v2 = vld [vmem:[#allocation5] ss:$8 sps:$4 sm:$0xff]   ;;  %vm311_vm0 = vcmask 261120   ;;  %v281_v8 = vlaneseq }
  0x68   : > { %906 = vsyncadd (%p1207_p3), [#allocation6], 4294966784  ;;  %347 = vmatprep.mubr.bf16.mxu0 %v961_v0  ;;  %315 = vmatprep.subr.bf16.mxu0 %v789_v1  ;;  %v792_v3 = vld [vmem:[#allocation5 + $0x14] ss:$8 sps:$4 sm:$0xff]   ;;  %v794_v4 = vld [vmem:[#allocation5 + $0x10] ss:$8 sps:$4 sm:$0xff]  }
  0x69   : > { %316 = vmatpush1.bf16.msra.mxu0 %v791_v2  ;;  %v272_v5 = vld [vmem:[%s231_s19] sm:$0xff]  ;;  %v273_v6 = vld [vmem:[%s231_s19 + $0x8] sm:$0xff]  ;;  %v282_v9 = vshrl.u32 %v281_v8, 7  ;;  %s388_s16 = sld [smem:[#allocation2]]  ;;  %vm392_vm1 = vcmask 7168   ;;  %s1141_s17 = scalar_lea.vmem [#allocation7], %s1123_s15  }
  0x6a   : > { %317 = vmatprep.subr.bf16.mxu0 %v792_v3  ;;  %v274_v7 = vpack.c.bf16 %v273_v6, %v272_v5  ;;  %v279_v11 = vld [vmem:[%s1191_s2] sm:$0x3]  ;;  %p1208_p6 = scmp.ne.s32.totalorder %s1200_s30, 0 }
  0x6b   : > { %v283_v10 = vsub.s32 0, %v282_v9  ;;  %v287_v12 = vsub.s32 1, %v282_v9  ;;  %v366_v16 = vld [vmem:[%s1192_s3] sm:$0x3]  ;;  %s656_s20 = sshll.u32 (%p1208_p6), %s1014_s4, 1  ;;  %s673_s23 = sshll.u32 (%p1208_p6), %s1014_s4, 4 }
  0x6c   : > { %s403_s25 = ssub.s32 (%p1208_p6), 3, %s656_s20  ;;  %s1152_s10 = scalar_lea.vmem (%p1208_p6), %s1194_s5, %s673_s23  }
  0x6d   : > { %318 = vmatpush1.bf16.msra.mxu0 %v794_v4  ;;  %v284_v13 = vrot.slane %v279_v11, %v283_v10  ;;  %v288_v14 = vrot.slane %v279_v11, %v287_v12  ;;  %v371_v24 = vrot.slane %v366_v16, %v283_v10  ;;  %v375_v27 = vrot.slane %v366_v16, %v287_v12  ;;  %p404_p7 = scmp.lt.s32.totalorder (%p1208_p6), %s403_s25, 2 }
  0x6f   : > { %v389_v40 = vstv %s388_s16 }
  0x70   : > { %654 = vmatmul.mubr.msk.bf16.vlgmr.msra.gmra.mrb[0].mxu0 %vm311_vm0, %v274_v7 }
 0x143   : > { %v349_v15 = vpop.f32.mrb[0].mxu0 }
 0x144   : > { %v350_v17 = vadd.f32 %v349_v15, %v284_v13  ;;  %v351_v18 = vpop.f32.mrb[1].mxu0 }
 0x145   : > { %v352_v19 = vadd.f32 %v351_v18, %v288_v14  ;;  %v353_v20 = vpop.f32.mrb[2].mxu0 }
 0x146   : > { %v358_v21 = vmul.f32 0.01, %v350_v17  ;;  %v354_v22 = vadd.f32 %v353_v20, %v284_v13  ;;  %v355_v23 = vpop.f32.mrb[3].mxu0 }
 0x147   : > { %v359_v25 = vmul.f32 0.01, %v352_v19  ;;  %v356_v26 = vadd.f32 %v355_v23, %v288_v14 }
 0x148   : > { %v362_v28 = vmax.f32 %v350_v17, %v358_v21  ;;  %v360_v29 = vmul.f32 0.01, %v354_v22 }
 0x149   : > { %v363_v30 = vmax.f32 %v352_v19, %v359_v25  ;;  %v361_v31 = vmul.f32 0.01, %v356_v26 }
 0x14a   : > { %v364_v32 = vmax.f32 %v354_v22, %v360_v29  ;;  %v378_v33 = vmul.f32 %v371_v24, %v362_v28 }
 0x14b   : > { %v365_v34 = vmax.f32 %v356_v26, %v361_v31  ;;  %v379_v35 = vmul.f32 %v375_v27, %v363_v30 }
 0x14c   : > { %v380_v36 = vmul.f32 %v371_v24, %v364_v32 }
 0x14d   : > { %v382_v37 = vadd.f32 %v379_v35, %v378_v33  ;;  %v381_v38 = vmul.f32 %v375_v27, %v365_v34 }
 0x14f   : > { %383 = vadd.xlane.f32.xlu0 %v382_v37  ;;  %v385_v39 = vadd.f32 %v381_v38, %v380_v36 }
 0x153   : > { %386 = vadd.xlane.f32.xlu0 %v385_v39 }
 0x1dc   : > { %v384_v41 = vpop.xlane.xlu0 %383 }
 0x1dd   : > { %v390_v42 = vadd.f32 %v389_v40, %v384_v41  ;;  %401 = sbr.rel (!%p1208_p6) target bundleno = 533 (0x215), region = 52 }
 0x1df   : > { %393 = vst.msk [vmem:[%s1141_s17] sm:$0xff] %vm392_vm1, %v390_v42 }
 0x1e0   : > { %v387_v43 = vpop.xlane.xlu0 %386 }
 0x1e1   : > { %v391_v44 = vadd.f32 %v389_v40, %v387_v43 }
 0x1e3   : > { %394 = vst.msk [vmem:[%s1141_s17 + $0x8] sm:$0xff] %vm392_vm1, %v391_v44 }
 0x1e4   : > { %s1216_s25 = smov (!%p404_p7, %s403_s25), 2 }
 0x1e5   : > { %s657_s11 = sshll.u32 %s1216_s25, 7 }
 0x1e6   : > { %p660_p9 = scmp.eq.s32.totalorder %s657_s11, 0 }
 0x1e7   : > { %s1158_s30 = sshrl.u32 (!%p660_p9), %s1216_s25, 1 }
 0x1e8   : > { %412 = sbr.rel (%p660_p9) target bundleno = 533 (0x215), region = 56  ;;  %p661_p12 = scmp.le.s32.totalorder (!%p660_p9), %s1158_s30, 0 }
 0x1ef   : > { %579 = sbr.rel (%p661_p12) target bundleno = 512 (0x200), region = 138  ;;  %s923_s4 = smov (!%p661_p12), %s1152_s10  }
 0x1f0   : > { %s927_s9 = smov (!%p661_p12), %s1141_s17   ;;  %s931_s8 = smov (!%p661_p12), 0  }
 0x1f1   : > { %s935_s28 = smov (!%p661_p12), 0  }
 0x1f6 LB: >> { %v476_v45 = vld [vmem:[%s929_s9] sm:$0xff]  ;;  %v478_v46 = vld [vmem:[%s929_s9 + $0x8] sm:$0xff]  ;;  %s480_s14 = sadd.s32 1, %s933_s8  ;;  %s470_s28 = sadd.s32 1, %s937_s28   ;;  %s937_s28 = sphi %s935_s28, %s470_s28   ;;  %s933_s8 = sphi %s931_s8, %s932_s8   ;;  %s929_s9 = sphi %s927_s9, %s485_s9   ;;  %s925_s4 = sphi %s923_s4, %s486_s4  }
 0x1f7   : >> { %477 = vst [vmem:[%s925_s4] sm:$0xff] %v476_v45  ;;  %479 = vst [vmem:[%s925_s4 + $0x8] sm:$0xff] %v478_v46  ;;  %p481_p0 = scmp.ge.s32.totalorder %s480_s14, %s1158_s30  ;;  %p469_p2 = scmp.ge.s32.totalorder %s470_s28, %s1158_s30 }
 0x1f9   : >> { %s1218_s14 = smov (%p481_p0, %s480_s14), 0  ;;  %472 = sbr.rel (!%p469_p2) target bundleno = 502 (0x1f6), region = 144 }
 0x1fa   : >> { %s662_s15 = sshll.u32 %s1218_s14, 4  ;;  %s932_s8 = smov %s1218_s14  }
 0x1fb   : >> { %s485_s9 = scalar_lea.vmem %s1141_s17, %s662_s15 [#allocation7]   ;;  %s486_s4 = scalar_lea.vmem %s1152_s10, %s662_s15  }
 0x200 PF: > { %s1168_s18 = sand.u32 1, %s1216_s25   ;;  %s674_s19 = sshll.u32 %s1158_s30, 4 }
 0x201   : > { %s491_s29 = scalar_lea.vmem %s1141_s17, %s674_s19 [#allocation7]   ;;  %s493_s6 = scalar_lea.vmem %s1152_s10, %s674_s19  }
 0x202   : > { %p667_p4 = scmp.le.s32.totalorder %s1168_s18, 0 }
 0x203   : > { %s939_s12 = smov (!%p667_p4), %s493_s6   ;;  %s943_s13 = smov (!%p667_p4), %s491_s29  }
 0x204   : > { %593 = sbr.rel (%p667_p4) target bundleno = 533 (0x215), region = 149  ;;  %s947_s16 = smov (!%p667_p4), 0  }
 0x205   : > { %s951_s20 = smov (!%p667_p4), 0  }
 0x20b LB: >> { %v503_v47 = vld [vmem:[%s945_s13] sm:$0xff]  ;;  %s505_s23 = sadd.s32 1, %s949_s16  ;;  %s497_s20 = sadd.s32 1, %s953_s20   ;;  %s953_s20 = sphi %s951_s20, %s497_s20   ;;  %s949_s16 = sphi %s947_s16, %s948_s16   ;;  %s945_s13 = sphi %s943_s13, %s510_s13   ;;  %s941_s12 = sphi %s939_s12, %s511_s12  }
 0x20c   : >> { %504 = vst [vmem:[%s941_s12] sm:$0xff] %v503_v47  ;;  %p506_p8 = scmp.ge.s32.totalorder %s505_s23, %s1168_s18  ;;  %p496_p10 = scmp.ge.s32.totalorder %s497_s20, %s1168_s18 }
 0x20e   : >> { %s1220_s23 = smov (%p506_p8, %s505_s23), 0  ;;  %499 = sbr.rel (!%p496_p10) target bundleno = 523 (0x20b), region = 155 }
 0x20f   : >> { %s668_s17 = sshll.u32 %s1220_s23, 3  ;;  %s948_s16 = smov %s1220_s23  }
 0x210   : >> { %s510_s13 = scalar_lea.vmem %s491_s29, %s668_s17 [#allocation7]   ;;  %s511_s12 = scalar_lea.vmem %s493_s6, %s668_s17  }
 0x215 PF: > { %p17_p13 = scmp.ge.s32.totalorder %s1017_s24, 4   ;;  %s1209_s20 = smov %s913_s21 }
 0x216   : > { %s1210_s21 = smov %s917_s22  ;;  %s1211_s22 = smov %s1027_s27 }
 0x217   : > { %s1212_s23 = smov %s1017_s24  ;;  %19 = sbr.rel (!%p17_p13) target bundleno = 6 (0x6), region = 166 }
 0x21e   :  { %527 = vsyncpa [#allocation4], 1 }
 0x21f   :  { %529 = vsyncpa [#allocation4 + $0x1], 1 }
 0x220   :  { %530 = vsyncpa [#allocation6], 1 }

</bundles_post_ra>
